<compile_context>
chip_gen: v7x
topology: tpu7x:2x2x1
jax: 0.10.0
libtpu: 0.0.40
codegen_flags: <defaults>
</compile_context>

<pallas_src>
import functools

import numpy as np
import jax
import jax.numpy as jnp
from jax.experimental import pallas as pl
from jax.experimental.pallas import tpu as pltpu


def _round_up(a, b):
    return ((a + b - 1) // b) * b


def _vmem_limit_bytes():
    """Generation-aware scoped-VMEM limit: ~3/4 of physical VMEM (>=32 MiB)."""
    cap = 64 * 1024 * 1024  # conservative fallback (v7x physical VMEM per TC)
    try:
        info = pltpu.get_tpu_info()
        cap = int(getattr(info, "vmem_capacity_bytes", cap)) or cap
    except Exception:
        pass
    return int(max(32 * 1024 * 1024, (cap * 3) // 4))


def _router_kernel(x_ref, w_ref, b_ref, logits_ref, probs_ref, disp_ref,
                   *, k, num_tokens, num_experts):
    x = x_ref[...]                                    # (bm, D)       pipelined
    w = w_ref[...]                                    # (E_pad, D)    resident
    b = b_ref[...]                                    # (1, E_pad)    resident

    # x @ w.T on the MXU with f32 accumulation; no wrapper-side transpose.
    acc = jax.lax.dot_general(x, w, (((1,), (1,)), ((), ())),
                              preferred_element_type=jnp.float32) + b
    bm, e_pad = acc.shape
    col = jax.lax.broadcasted_iota(jnp.int32, (bm, e_pad), 1)
    real = col < num_experts
    neg = jnp.float32(-jnp.inf)

    # padded expert columns must never win anything
    acc = jnp.where(real, acc, jnp.float32(-1e30))

    # torch: logits leave nn.Linear in x.dtype; softmax upcasts those to the
    # router dtype.  Round through the output dtype to match.
    logits_x = acc.astype(logits_ref.dtype)
    logits_ref[...] = logits_x

    lx = logits_x.astype(jnp.float32)
    m = jnp.max(lx, axis=-1, keepdims=True)
    e = jnp.where(real, jnp.exp(lx - m), 0.0)
    probs = e / jnp.sum(e, axis=-1, keepdims=True)
    probs_rd = probs.astype(probs_ref.dtype)
    probs_ref[...] = probs_rd

    # Rank in f32 (equality-based membership below relies on exactness).
    p = probs_rd.astype(jnp.float32)
    # torch stores topk_probs.to(x.dtype) into the (router-dtype) output.
    disp_val = probs_rd.astype(logits_ref.dtype).astype(jnp.float32)

    # k rounds of (row max, lowest expert index achieving it, mask it out).
    sel = p
    for _ in range(k):
        best = jnp.max(sel, axis=-1, keepdims=True)
        idx = jnp.min(jnp.where(sel == best, col, e_pad), axis=-1, keepdims=True)
        sel = jnp.where(col == idx, neg, sel)

    # selected positions are exactly those masked to -inf (p itself is finite)
    disp = jnp.where(sel == neg, disp_val, neg)

    # zero-padded tokens (global id >= num_tokens) must never be dispatched
    row = jax.lax.broadcasted_iota(jnp.int32, (bm, e_pad), 0)
    tok = pl.program_id(0) * bm + row
    disp_ref[...] = jnp.where(tok < num_tokens, disp, neg)


def _dispatch_kernel(disp_ref, ep_ref, ei_ref, carry_s, carry_i, prev_s, prev_i,
                     *, capacity, num_chunks):
    c = pl.program_id(1)                      # token-chunk index ("arbitrary")
    tc, te = disp_ref.shape
    neg = jnp.float32(-jnp.inf)
    big = jnp.int32(jnp.iinfo(jnp.int32).max)

    @pl.when(c == 0)
    def _():
        carry_s[...] = jnp.full((capacity, te), neg, jnp.float32)
        carry_i[...] = jnp.full((capacity, te), big, jnp.int32)

    # Snapshot the running carry; the merged result is rebuilt into carry_*.
    prev_s[...] = carry_s[...]
    prev_i[...] = carry_i[...]

    row = jax.lax.broadcasted_iota(jnp.int32, (tc, te), 0)
    gid = c * tc + row                        # global token ids of this chunk
    crow = jax.lax.broadcasted_iota(jnp.int32, (capacity, te), 0)

    def merge_round(r, carry):
        s = disp_ref[...]                     # (tc, te)  chunk scores (in place)
        ps = prev_s[...]                      # (cap, te) remaining old carry
        pi = prev_i[...]

        best_c = jnp.max(s, axis=0, keepdims=True)                    # (1, te)
        id_c = jnp.min(jnp.where(s == best_c, gid, big), axis=0, keepdims=True)
        best_p = jnp.max(ps, axis=0, keepdims=True)
        id_p = jnp.min(jnp.where(ps == best_p, pi, big), axis=0, keepdims=True)

        # lower token id wins ties (torch flattens token-major / sorts stably)
        take_p = (best_p > best_c) | ((best_p == best_c) & (id_p < id_c))
        sel_s = jnp.where(take_p, best_p, best_c)
        sel_i = jnp.where(take_p, id_p, id_c)

        carry_s[...] = jnp.where(crow == r, sel_s, carry_s[...])
        carry_i[...] = jnp.where(crow == r, sel_i, carry_i[...])

        # remove the winner from its source so the next round sees the rest
        prev_s[...] = jnp.where(take_p & (ps == best_p) & (pi == id_p), neg, ps)
        disp_ref[...] = jnp.where((~take_p) & (s == best_c) & (gid == id_c), neg, s)
        return carry

    jax.lax.fori_loop(0, capacity, merge_round, 0, unroll=capacity <= 8)

    @pl.when(c == num_chunks - 1)
    def _():
        cs = carry_s[...]
        valid = cs > neg
        ep_ref[...] = jnp.where(valid, cs, 0.0).astype(ep_ref.dtype)
        ei_ref[...] = jnp.where(valid, carry_i[...], jnp.int32(-1))


def topk_router_forward(x, weight, bias, k, expert_capacity,
                        router_dtype=jnp.float32,
                        token_tile=None, dispatch_chunk=None):
    """TopKRouter.forward (eval mode).

    x:      (num_tokens, d_model)
    weight: (num_experts, d_model)   -- nn.Linear weight
    bias:   (num_experts,) or None   -- nn.Linear bias
    Returns (logits, probs, expert_probs, expert_indices).
    """
    N, D = x.shape
    E = weight.shape[0]
    k = min(int(k), E)
    capacity = int(expert_capacity)
    assert capacity >= 1
    E_pad = _round_up(E, 128)                 # lane-dense expert axis
    isz = jnp.dtype(x.dtype).itemsize
    vmem_limit = _vmem_limit_bytes()

    # --- token tile for the router: biggest tile that fits the VMEM budget ---
    if token_tile is not None:
        tn = max(8, _round_up(int(token_tile), 8))
    else:
        budget = (vmem_limit * 3) // 5        # headroom for Mosaic internals
        w_bytes = E_pad * D * isz             # resident weight, single-buffered
        per_row = 2 * D * isz + 2 * E_pad * isz + 16 * E_pad   # x + 3 outs (2-buf)
        rows = max(0, budget - w_bytes - 8 * E_pad) // per_row
        tn = int(max(8, min(512, (rows // 8) * 8)))
        # TODO(synk): for very large d_model add a K-reduction grid axis over D
        # (with an f32 accumulator scratch) instead of shrinking the token tile.
    tn = min(tn, _round_up(N, 8))
    if N > 8:  # >= 2 grid steps on the token-parallel axis (v7x megacore)
        tn = min(tn, max(8, _round_up((N + 1) // 2, 8)))

    # --- dispatch token chunk: a multiple of tn, ~512 rows --------------------
    if dispatch_chunk is not None:
        dc = _round_up(max(int(dispatch_chunk), tn), tn)
    else:
        dc = tn * max(1, 512 // tn)
    dc = min(dc, _round_up(N, tn))
    n_pad = _round_up(N, dc)
    n_chunks = n_pad // dc

    x_pad = x if n_pad == N else jnp.pad(x, ((0, n_pad - N), (0, 0)))
    w_p = weight.astype(x.dtype)
    if E_pad != E:
        w_p = jnp.pad(w_p, ((0, E_pad - E), (0, 0)))
    if bias is None:
        bias = jnp.zeros((E,), jnp.float32)
    b_p = jnp.pad(bias.astype(jnp.float32), (0, E_pad - E)).reshape(1, E_pad)

    # --- kernel 1: logits / probs / masked dispatch-score table --------------
    def _run_router(single_buffer_weights):
        if single_buffer_weights:
            w_spec = pl.BlockSpec((E_pad, D), lambda i: (0, 0),
                                  pipeline_mode=pl.Buffered(1))
            b_spec = pl.BlockSpec((1, E_pad), lambda i: (0, 0),
                                  pipeline_mode=pl.Buffered(1))
        else:
            w_spec = pl.BlockSpec((E_pad, D), lambda i: (0, 0))
            b_spec = pl.BlockSpec((1, E_pad), lambda i: (0, 0))
        return pl.pallas_call(
            functools.partial(_router_kernel, k=k, num_tokens=N, num_experts=E),
            grid=(n_pad // tn,),
            in_specs=[pl.BlockSpec((tn, D), lambda i: (i, 0)), w_spec, b_spec],
            out_specs=(
                pl.BlockSpec((tn, E_pad), lambda i: (i, 0)),
                pl.BlockSpec((tn, E_pad), lambda i: (i, 0)),
                pl.BlockSpec((tn, E_pad), lambda i: (i, 0)),
            ),
            out_shape=(
                jax.ShapeDtypeStruct((n_pad, E_pad), x.dtype),        # logits
                jax.ShapeDtypeStruct((n_pad, E_pad), router_dtype),   # probs
                jax.ShapeDtypeStruct((n_pad, E_pad), jnp.float32),    # disp table
            ),
            compiler_params=pltpu.CompilerParams(
                dimension_semantics=("parallel",),
                vmem_limit_bytes=vmem_limit),
        )(x_pad, w_p, b_p)

    try:
        logits_full, probs_full, disp = _run_router(True)
    except Exception:
        # pl.Buffered(1) not supported by this jax -> default double-buffering.
        logits_full, probs_full, disp = _run_router(False)

    # --- kernel 2: streamed expert-choice dispatch ----------------------------
    # NOTE(perf/v7x): with E <= 128 the "parallel" axis has a single step; a
    # two-core split of the token axis would need an extra tiny merge kernel.
    ep_t, ei_t = pl.pallas_call(
        functools.partial(_dispatch_kernel, capacity=capacity,
                          num_chunks=n_chunks),
        grid=(E_pad // 128, n_chunks),
        in_specs=[pl.BlockSpec((dc, 128), lambda j, c: (c, j))],
        out_specs=(
            pl.BlockSpec((capacity, 128), lambda j, c: (0, j)),
            pl.BlockSpec((capacity, 128), lambda j, c: (0, j)),
        ),
        out_shape=(
            jax.ShapeDtypeStruct((capacity, E_pad), router_dtype),   # probs^T
            jax.ShapeDtypeStruct((capacity, E_pad), jnp.int32),      # token ids^T
        ),
        scratch_shapes=[
            pltpu.VMEM((capacity, 128), jnp.float32),   # running carry: scores
            pltpu.VMEM((capacity, 128), jnp.int32),     # running carry: ids
            pltpu.VMEM((capacity, 128), jnp.float32),   # per-chunk snapshot
            pltpu.VMEM((capacity, 128), jnp.int32),
        ],
        compiler_params=pltpu.CompilerParams(
            dimension_semantics=("parallel", "arbitrary"),
            vmem_limit_bytes=vmem_limit),
    )(disp)

    logits = logits_full[:N, :E]
    probs = probs_full[:N, :E]
    expert_probs = ep_t[:, :E].T         # tiny (capacity, E) -> (E, capacity)
    expert_indices = ei_t[:, :E].T
    return logits, probs, expert_probs, expert_indices


def _reference_dispatch(probs_np, k, capacity):
    """Pure-numpy replica of the torch top-k + per-expert sort/dispatch."""
    N, E = probs_np.shape
    order = np.argsort(-probs_np, axis=-1, kind="stable")
    topk_ids = order[:, :k]
    topk_p = np.take_along_axis(probs_np, topk_ids, axis=-1).astype(np.float32)
    flat_ids = topk_ids.reshape(-1)
    flat_p = topk_p.reshape(-1)
    flat_tok = np.repeat(np.arange(N), k)
    ep = np.zeros((E, capacity), dtype=np.float32)
    ei = np.full((E, capacity), -1, dtype=np.int32)
    for e in range(E):
        msk = flat_ids == e
        toks, ps = flat_tok[msk], flat_p[msk]
        if toks.size:
            si = np.argsort(-ps, kind="stable")
            keep = min(capacity, ps.size)
            ep[e, :keep] = ps[si[:keep]]
            ei[e, :keep] = toks[si[:keep]]
    return ep, ei


if __name__ == "__main__":
    d_model, num_experts = 32, 8
    num_tokens, k, expert_capacity = 20, 2, 4

    key = jax.random.PRNGKey(0)
    kx, kw, kb = jax.random.split(key, 3)
    x = jax.random.normal(kx, (num_tokens, d_model), dtype=jnp.float32)
    # deterministic nn.Linear(d_model, num_experts, bias=True)-style init
    lim = 1.0 / np.sqrt(d_model)
    weight = jax.random.uniform(kw, (num_experts, d_model),
                                minval=-lim, maxval=lim, dtype=jnp.float32)
    bias = jax.random.uniform(kb, (num_experts,),
                              minval=-lim, maxval=lim, dtype=jnp.float32)

    # small tiles force a multi-step token grid, token padding, and a
    # multi-chunk streamed dispatch merge
    outs = topk_router_forward(x, weight, bias, k, expert_capacity,
                               token_tile=8, dispatch_chunk=16)
    logits, probs, expert_probs, expert_indices = jax.block_until_ready(outs)

    # correctness checks (float64 numpy reference; tolerance covers MXU f32)
    xn = np.asarray(x, dtype=np.float64)
    wn = np.asarray(weight, dtype=np.float64)
    bn = np.asarray(bias, dtype=np.float64)
    logits_ref = xn @ wn.T + bn
    probs_ref = np.exp(logits_ref - logits_ref.max(-1, keepdims=True))
    probs_ref /= probs_ref.sum(-1, keepdims=True)

    assert logits.shape == (num_tokens, num_experts)
    assert probs.shape == (num_tokens, num_experts)
    assert np.allclose(np.asarray(logits), logits_ref, atol=2e-3, rtol=2e-3)
    assert np.allclose(np.asarray(probs), probs_ref, atol=2e-3, rtol=2e-3)

    # dispatch is checked bit-exactly against the kernel's own probs
    ep_ref, ei_ref = _reference_dispatch(np.asarray(probs), k, expert_capacity)
    assert expert_probs.shape == (num_experts, expert_capacity)
    assert expert_indices.shape == (num_experts, expert_capacity)
    assert np.allclose(np.asarray(expert_probs), ep_ref, atol=1e-6)
    assert np.array_equal(np.asarray(expert_indices), ei_ref)

    print("KERNEL_OK")
</pallas_src>

<mosaic_0001>
module attributes {stable_mosaic.version = 11 : i64} {
  func.func @_router_kernel(%arg0: i32, %arg1: memref<8x32xf32, #tpu.memory_space<vmem>>, %arg2: memref<128x32xf32, #tpu.memory_space<vmem>>, %arg3: memref<1x128xf32, #tpu.memory_space<vmem>>, %arg4: memref<8x128xf32, #tpu.memory_space<vmem>>, %arg5: memref<8x128xf32, #tpu.memory_space<vmem>>, %arg6: memref<8x128xf32, #tpu.memory_space<vmem>>) attributes {dimension_semantics = [#tpu.dimension_semantics<parallel>], iteration_bounds = array<i64: 4>, scalar_prefetch = 0 : i64, scratch_operands = 0 : i64, tpu.core_type = #tpu.core_type<tc>, window_params = [{transform_indices = @transform_0, window_bounds = array<i64: 8, 32>}, {pipeline_mode = #tpu.pipeline_mode<synchronous>, transform_indices = @transform_1, window_bounds = array<i64: 128, 32>}, {pipeline_mode = #tpu.pipeline_mode<synchronous>, transform_indices = @transform_2, window_bounds = array<i64: 1, 128>}, {transform_indices = @transform_3, window_bounds = array<i64: 8, 128>}, {transform_indices = @transform_4, window_bounds = array<i64: 8, 128>}, {transform_indices = @transform_5, window_bounds = array<i64: 8, 128>}]} {
    %c0 = arith.constant 0 : index
    %c0_0 = arith.constant 0 : index
    %0 = vector.load %arg1[%c0, %c0_0] : memref<8x32xf32, #tpu.memory_space<vmem>>, vector<8x32xf32>
    %c0_1 = arith.constant 0 : index
    %c0_2 = arith.constant 0 : index
    %1 = vector.load %arg2[%c0_1, %c0_2] : memref<128x32xf32, #tpu.memory_space<vmem>>, vector<128x32xf32>
    %c0_3 = arith.constant 0 : index
    %c0_4 = arith.constant 0 : index
    %2 = vector.load %arg3[%c0_3, %c0_4] : memref<1x128xf32, #tpu.memory_space<vmem>>, vector<1x128xf32>
    %cst = arith.constant dense<0.000000e+00> : vector<8x128xf32>
    %3 = tpu.matmul %0, %1, %cst {dimension_numbers = #tpu.dot_dimension_numbers<[1], [1], [0], [0], [0, 0, 1, 0], [], []>} : vector<8x32xf32>, vector<128x32xf32>, vector<8x128xf32> -> vector<8x128xf32>
    %4 = vector.broadcast %2 : vector<1x128xf32> to vector<8x128xf32>
    %5 = arith.addf %3, %4 : vector<8x128xf32>
    %6 = tpu.iota {dimensions = array<i32: 1>} : vector<8x128xi32>
    %c8_i32 = arith.constant 8 : i32
    %7 = vector.broadcast %c8_i32 : i32 to vector<8x128xi32>
    %8 = arith.cmpi slt, %6, %7 : vector<8x128xi32>
    %cst_5 = arith.constant -1.000000e+30 : f32
    %9 = vector.broadcast %cst_5 : f32 to vector<8x128xf32>
    %10 = arith.select %8, %5, %9 : vector<8x128xi1>, vector<8x128xf32>
    %c0_6 = arith.constant 0 : index
    %c0_7 = arith.constant 0 : index
    %11 = vector.load %arg4[%c0_6, %c0_7] : memref<8x128xf32, #tpu.memory_space<vmem>>, vector<8x128xf32>
    tpu.vector_store %arg4[%c0_6, %c0_7], %10 {strides = array<i32>} : memref<8x128xf32, #tpu.memory_space<vmem>>, vector<8x128xf32>,
    %cst_8 = arith.constant dense<0xFF800000> : vector<8xf32>
    %12 = vector.multi_reduction <maximumf>, %10, %cst_8 [1] : vector<8x128xf32> to vector<8xf32>
    %13 = vector.shape_cast %12 : vector<8xf32> to vector<8x1xf32>
    %14 = vector.broadcast %13 : vector<8x1xf32> to vector<8x128xf32>
    %15 = arith.subf %10, %14 : vector<8x128xf32>
    %16 = math.exp %15 : vector<8x128xf32>
    %cst_9 = arith.constant 0.000000e+00 : f32
    %17 = vector.broadcast %cst_9 : f32 to vector<8x128xf32>
    %18 = arith.select %8, %16, %17 : vector<8x128xi1>, vector<8x128xf32>
    %cst_10 = arith.constant dense<0.000000e+00> : vector<8xf32>
    %19 = vector.multi_reduction <add>, %18, %cst_10 [1] : vector<8x128xf32> to vector<8xf32>
    %20 = vector.shape_cast %19 : vector<8xf32> to vector<8x1xf32>
    %21 = vector.broadcast %20 : vector<8x1xf32> to vector<8x128xf32>
    %22 = arith.divf %18, %21 : vector<8x128xf32>
    %c0_11 = arith.constant 0 : index
    %c0_12 = arith.constant 0 : index
    %23 = vector.load %arg5[%c0_11, %c0_12] : memref<8x128xf32, #tpu.memory_space<vmem>>, vector<8x128xf32>
    tpu.vector_store %arg5[%c0_11, %c0_12], %22 {strides = array<i32>} : memref<8x128xf32, #tpu.memory_space<vmem>>, vector<8x128xf32>,
    %cst_13 = arith.constant dense<0xFF800000> : vector<8xf32>
    %24 = vector.multi_reduction <maximumf>, %22, %cst_13 [1] : vector<8x128xf32> to vector<8xf32>
    %25 = vector.shape_cast %24 : vector<8xf32> to vector<8x1xf32>
    %26 = vector.broadcast %25 : vector<8x1xf32> to vector<8x128xf32>
    %27 = arith.cmpf oeq, %22, %26 : vector<8x128xf32>
    %c128_i32 = arith.constant 128 : i32
    %28 = vector.broadcast %c128_i32 : i32 to vector<8x128xi32>
    %29 = arith.select %27, %6, %28 : vector<8x128xi1>, vector<8x128xi32>
    %cst_14 = arith.constant dense<2147483647> : vector<8xi32>
    %30 = vector.multi_reduction <minsi>, %29, %cst_14 [1] : vector<8x128xi32> to vector<8xi32>
    %31 = vector.shape_cast %30 : vector<8xi32> to vector<8x1xi32>
    %32 = vector.broadcast %31 : vector<8x1xi32> to vector<8x128xi32>
    %33 = arith.cmpi eq, %6, %32 : vector<8x128xi32>
    %cst_15 = arith.constant 0xFF800000 : f32
    %34 = vector.broadcast %cst_15 : f32 to vector<8x128xf32>
    %35 = arith.select %33, %34, %22 : vector<8x128xi1>, vector<8x128xf32>
    %cst_16 = arith.constant dense<0xFF800000> : vector<8xf32>
    %36 = vector.multi_reduction <maximumf>, %35, %cst_16 [1] : vector<8x128xf32> to vector<8xf32>
    %37 = vector.shape_cast %36 : vector<8xf32> to vector<8x1xf32>
    %38 = vector.broadcast %37 : vector<8x1xf32> to vector<8x128xf32>
    %39 = arith.cmpf oeq, %35, %38 : vector<8x128xf32>
    %c128_i32_17 = arith.constant 128 : i32
    %40 = vector.broadcast %c128_i32_17 : i32 to vector<8x128xi32>
    %41 = arith.select %39, %6, %40 : vector<8x128xi1>, vector<8x128xi32>
    %cst_18 = arith.constant dense<2147483647> : vector<8xi32>
    %42 = vector.multi_reduction <minsi>, %41, %cst_18 [1] : vector<8x128xi32> to vector<8xi32>
    %43 = vector.shape_cast %42 : vector<8xi32> to vector<8x1xi32>
    %44 = vector.broadcast %43 : vector<8x1xi32> to vector<8x128xi32>
    %45 = arith.cmpi eq, %6, %44 : vector<8x128xi32>
    %cst_19 = arith.constant 0xFF800000 : f32
    %46 = vector.broadcast %cst_19 : f32 to vector<8x128xf32>
    %47 = arith.select %45, %46, %35 : vector<8x128xi1>, vector<8x128xf32>
    %cst_20 = arith.constant 0xFF800000 : f32
    %48 = vector.broadcast %cst_20 : f32 to vector<8x128xf32>
    %49 = arith.cmpf oeq, %47, %48 : vector<8x128xf32>
    %cst_21 = arith.constant 0xFF800000 : f32
    %50 = vector.broadcast %cst_21 : f32 to vector<8x128xf32>
    %51 = arith.select %49, %22, %50 : vector<8x128xi1>, vector<8x128xf32>
    %52 = tpu.iota {dimensions = array<i32: 0>} : vector<8x128xi32>
    %c8_i32_22 = arith.constant 8 : i32
    %53 = arith.muli %arg0, %c8_i32_22 : i32
    %54 = vector.broadcast %53 : i32 to vector<8x128xi32>
    %55 = arith.addi %54, %52 : vector<8x128xi32>
    %c20_i32 = arith.constant 20 : i32
    %56 = vector.broadcast %c20_i32 : i32 to vector<8x128xi32>
    %57 = arith.cmpi slt, %55, %56 : vector<8x128xi32>
    %cst_23 = arith.constant 0xFF800000 : f32
    %58 = vector.broadcast %cst_23 : f32 to vector<8x128xf32>
    %59 = arith.select %57, %51, %58 : vector<8x128xi1>, vector<8x128xf32>
    %c0_24 = arith.constant 0 : index
    %c0_25 = arith.constant 0 : index
    %60 = vector.load %arg6[%c0_24, %c0_25] : memref<8x128xf32, #tpu.memory_space<vmem>>, vector<8x128xf32>
    tpu.vector_store %arg6[%c0_24, %c0_25], %59 {strides = array<i32>} : memref<8x128xf32, #tpu.memory_space<vmem>>, vector<8x128xf32>,
    return
  }
  func.func @transform_0(%arg0: i32) -> (i32, i32) {
    %c0_i32 = arith.constant 0 : i32
    %c0_i32_0 = arith.constant 0 : i32
    return %arg0, %c0_i32 : i32, i32
  }
  func.func @transform_1(%arg0: i32) -> (i32, i32) {
    %c0_i32 = arith.constant 0 : i32
    %c0_i32_0 = arith.constant 0 : i32
    %c0_i32_1 = arith.constant 0 : i32
    return %c0_i32, %c0_i32_0 : i32, i32
  }
  func.func @transform_2(%arg0: i32) -> (i32, i32) {
    %c0_i32 = arith.constant 0 : i32
    %c0_i32_0 = arith.constant 0 : i32
    %c0_i32_1 = arith.constant 0 : i32
    return %c0_i32, %c0_i32_0 : i32, i32
  }
  func.func @transform_3(%arg0: i32) -> (i32, i32) {
    %c0_i32 = arith.constant 0 : i32
    %c0_i32_0 = arith.constant 0 : i32
    return %arg0, %c0_i32 : i32, i32
  }
  func.func @transform_4(%arg0: i32) -> (i32, i32) {
    %c0_i32 = arith.constant 0 : i32
    %c0_i32_0 = arith.constant 0 : i32
    return %arg0, %c0_i32 : i32, i32
  }
  func.func @transform_5(%arg0: i32) -> (i32, i32) {
    %c0_i32 = arith.constant 0 : i32
    %c0_i32_0 = arith.constant 0 : i32
    return %arg0, %c0_i32 : i32, i32
  }
}

module attributes {stable_mosaic.version = 11 : i64} {
  func.func @_router_kernel(%arg0: i32, %arg1: memref<8x32xf32, #tpu.memory_space<vmem>>, %arg2: memref<128x32xf32, #tpu.memory_space<vmem>>, %arg3: memref<1x128xf32, #tpu.memory_space<vmem>>, %arg4: memref<8x128xf32, #tpu.memory_space<vmem>>, %arg5: memref<8x128xf32, #tpu.memory_space<vmem>>, %arg6: memref<8x128xf32, #tpu.memory_space<vmem>>) attributes {dimension_semantics = [#tpu.dimension_semantics<parallel>], iteration_bounds = array<i64: 4>, scalar_prefetch = 0 : i64, scratch_operands = 0 : i64, tpu.core_type = #tpu.core_type<tc>, window_params = [{transform_indices = @transform_0, window_bounds = array<i64: 8, 32>}, {pipeline_mode = #tpu.pipeline_mode<synchronous>, transform_indices = @transform_1, window_bounds = array<i64: 128, 32>}, {pipeline_mode = #tpu.pipeline_mode<synchronous>, transform_indices = @transform_2, window_bounds = array<i64: 1, 128>}, {transform_indices = @transform_3, window_bounds = array<i64: 8, 128>}, {transform_indices = @transform_4, window_bounds = array<i64: 8, 128>}, {transform_indices = @transform_5, window_bounds = array<i64: 8, 128>}]} {
    %c0 = arith.constant 0 : index
    %c0_0 = arith.constant 0 : index
    %0 = vector.load %arg1[%c0, %c0_0] : memref<8x32xf32, #tpu.memory_space<vmem>>, vector<8x32xf32>
    %c0_1 = arith.constant 0 : index
    %c0_2 = arith.constant 0 : index
    %1 = vector.load %arg2[%c0_1, %c0_2] : memref<128x32xf32, #tpu.memory_space<vmem>>, vector<128x32xf32>
    %c0_3 = arith.constant 0 : index
    %c0_4 = arith.constant 0 : index
    %2 = vector.load %arg3[%c0_3, %c0_4] : memref<1x128xf32, #tpu.memory_space<vmem>>, vector<1x128xf32>
    %cst = arith.constant dense<0.000000e+00> : vector<8x128xf32>
    %3 = tpu.matmul %0, %1, %cst {dimension_numbers = #tpu.dot_dimension_numbers<[1], [1], [0], [0], [0, 0, 1, 0], [], []>} : vector<8x32xf32>, vector<128x32xf32>, vector<8x128xf32> -> vector<8x128xf32>
    %4 = vector.broadcast %2 : vector<1x128xf32> to vector<8x128xf32>
    %5 = arith.addf %3, %4 : vector<8x128xf32>
    %6 = tpu.iota {dimensions = array<i32: 1>} : vector<8x128xi32>
    %c8_i32 = arith.constant 8 : i32
    %7 = vector.broadcast %c8_i32 : i32 to vector<8x128xi32>
    %8 = arith.cmpi slt, %6, %7 : vector<8x128xi32>
    %cst_5 = arith.constant -1.000000e+30 : f32
    %9 = vector.broadcast %cst_5 : f32 to vector<8x128xf32>
    %10 = arith.select %8, %5, %9 : vector<8x128xi1>, vector<8x128xf32>
    %c0_6 = arith.constant 0 : index
    %c0_7 = arith.constant 0 : index
    %11 = vector.load %arg4[%c0_6, %c0_7] : memref<8x128xf32, #tpu.memory_space<vmem>>, vector<8x128xf32>
    tpu.vector_store %arg4[%c0_6, %c0_7], %10 {strides = array<i32>} : memref<8x128xf32, #tpu.memory_space<vmem>>, vector<8x128xf32>,
    %cst_8 = arith.constant dense<0xFF800000> : vector<8xf32>
    %12 = vector.multi_reduction <maximumf>, %10, %cst_8 [1] : vector<8x128xf32> to vector<8xf32>
    %13 = vector.shape_cast %12 : vector<8xf32> to vector<8x1xf32>
    %14 = vector.broadcast %13 : vector<8x1xf32> to vector<8x128xf32>
    %15 = arith.subf %10, %14 : vector<8x128xf32>
    %16 = math.exp %15 : vector<8x128xf32>
    %cst_9 = arith.constant 0.000000e+00 : f32
    %17 = vector.broadcast %cst_9 : f32 to vector<8x128xf32>
    %18 = arith.select %8, %16, %17 : vector<8x128xi1>, vector<8x128xf32>
    %cst_10 = arith.constant dense<0.000000e+00> : vector<8xf32>
    %19 = vector.multi_reduction <add>, %18, %cst_10 [1] : vector<8x128xf32> to vector<8xf32>
    %20 = vector.shape_cast %19 : vector<8xf32> to vector<8x1xf32>
    %21 = vector.broadcast %20 : vector<8x1xf32> to vector<8x128xf32>
    %22 = arith.divf %18, %21 : vector<8x128xf32>
    %c0_11 = arith.constant 0 : index
    %c0_12 = arith.constant 0 : index
    %23 = vector.load %arg5[%c0_11, %c0_12] : memref<8x128xf32, #tpu.memory_space<vmem>>, vector<8x128xf32>
    tpu.vector_store %arg5[%c0_11, %c0_12], %22 {strides = array<i32>} : memref<8x128xf32, #tpu.memory_space<vmem>>, vector<8x128xf32>,
    %cst_13 = arith.constant dense<0xFF800000> : vector<8xf32>
    %24 = vector.multi_reduction <maximumf>, %22, %cst_13 [1] : vector<8x128xf32> to vector<8xf32>
    %25 = vector.shape_cast %24 : vector<8xf32> to vector<8x1xf32>
    %26 = vector.broadcast %25 : vector<8x1xf32> to vector<8x128xf32>
    %27 = arith.cmpf oeq, %22, %26 : vector<8x128xf32>
    %c128_i32 = arith.constant 128 : i32
    %28 = vector.broadcast %c128_i32 : i32 to vector<8x128xi32>
    %29 = arith.select %27, %6, %28 : vector<8x128xi1>, vector<8x128xi32>
    %cst_14 = arith.constant dense<2147483647> : vector<8xi32>
    %30 = vector.multi_reduction <minsi>, %29, %cst_14 [1] : vector<8x128xi32> to vector<8xi32>
    %31 = vector.shape_cast %30 : vector<8xi32> to vector<8x1xi32>
    %32 = vector.broadcast %31 : vector<8x1xi32> to vector<8x128xi32>
    %33 = arith.cmpi eq, %6, %32 : vector<8x128xi32>
    %cst_15 = arith.constant 0xFF800000 : f32
    %34 = vector.broadcast %cst_15 : f32 to vector<8x128xf32>
    %35 = arith.select %33, %34, %22 : vector<8x128xi1>, vector<8x128xf32>
    %cst_16 = arith.constant dense<0xFF800000> : vector<8xf32>
    %36 = vector.multi_reduction <maximumf>, %35, %cst_16 [1] : vector<8x128xf32> to vector<8xf32>
    %37 = vector.shape_cast %36 : vector<8xf32> to vector<8x1xf32>
    %38 = vector.broadcast %37 : vector<8x1xf32> to vector<8x128xf32>
    %39 = arith.cmpf oeq, %35, %38 : vector<8x128xf32>
    %c128_i32_17 = arith.constant 128 : i32
    %40 = vector.broadcast %c128_i32_17 : i32 to vector<8x128xi32>
    %41 = arith.select %39, %6, %40 : vector<8x128xi1>, vector<8x128xi32>
    %cst_18 = arith.constant dense<2147483647> : vector<8xi32>
    %42 = vector.multi_reduction <minsi>, %41, %cst_18 [1] : vector<8x128xi32> to vector<8xi32>
    %43 = vector.shape_cast %42 : vector<8xi32> to vector<8x1xi32>
    %44 = vector.broadcast %43 : vector<8x1xi32> to vector<8x128xi32>
    %45 = arith.cmpi eq, %6, %44 : vector<8x128xi32>
    %cst_19 = arith.constant 0xFF800000 : f32
    %46 = vector.broadcast %cst_19 : f32 to vector<8x128xf32>
    %47 = arith.select %45, %46, %35 : vector<8x128xi1>, vector<8x128xf32>
    %cst_20 = arith.constant 0xFF800000 : f32
    %48 = vector.broadcast %cst_20 : f32 to vector<8x128xf32>
    %49 = arith.cmpf oeq, %47, %48 : vector<8x128xf32>
    %cst_21 = arith.constant 0xFF800000 : f32
    %50 = vector.broadcast %cst_21 : f32 to vector<8x128xf32>
    %51 = arith.select %49, %22, %50 : vector<8x128xi1>, vector<8x128xf32>
    %52 = tpu.iota {dimensions = array<i32: 0>} : vector<8x128xi32>
    %c8_i32_22 = arith.constant 8 : i32
    %53 = arith.muli %arg0, %c8_i32_22 : i32
    %54 = vector.broadcast %53 : i32 to vector<8x128xi32>
    %55 = arith.addi %54, %52 : vector<8x128xi32>
    %c20_i32 = arith.constant 20 : i32
    %56 = vector.broadcast %c20_i32 : i32 to vector<8x128xi32>
    %57 = arith.cmpi slt, %55, %56 : vector<8x128xi32>
    %cst_23 = arith.constant 0xFF800000 : f32
    %58 = vector.broadcast %cst_23 : f32 to vector<8x128xf32>
    %59 = arith.select %57, %51, %58 : vector<8x128xi1>, vector<8x128xf32>
    %c0_24 = arith.constant 0 : index
    %c0_25 = arith.constant 0 : index
    %60 = vector.load %arg6[%c0_24, %c0_25] : memref<8x128xf32, #tpu.memory_space<vmem>>, vector<8x128xf32>
    tpu.vector_store %arg6[%c0_24, %c0_25], %59 {strides = array<i32>} : memref<8x128xf32, #tpu.memory_space<vmem>>, vector<8x128xf32>,
    return
  }
  func.func @transform_0(%arg0: i32) -> (i32, i32) {
    %c0_i32 = arith.constant 0 : i32
    %c0_i32_0 = arith.constant 0 : i32
    return %arg0, %c0_i32 : i32, i32
  }
  func.func @transform_1(%arg0: i32) -> (i32, i32) {
    %c0_i32 = arith.constant 0 : i32
    %c0_i32_0 = arith.constant 0 : i32
    %c0_i32_1 = arith.constant 0 : i32
    return %c0_i32, %c0_i32_0 : i32, i32
  }
  func.func @transform_2(%arg0: i32) -> (i32, i32) {
    %c0_i32 = arith.constant 0 : i32
    %c0_i32_0 = arith.constant 0 : i32
    %c0_i32_1 = arith.constant 0 : i32
    return %c0_i32, %c0_i32_0 : i32, i32
  }
  func.func @transform_3(%arg0: i32) -> (i32, i32) {
    %c0_i32 = arith.constant 0 : i32
    %c0_i32_0 = arith.constant 0 : i32
    return %arg0, %c0_i32 : i32, i32
  }
  func.func @transform_4(%arg0: i32) -> (i32, i32) {
    %c0_i32 = arith.constant 0 : i32
    %c0_i32_0 = arith.constant 0 : i32
    return %arg0, %c0_i32 : i32, i32
  }
  func.func @transform_5(%arg0: i32) -> (i32, i32) {
    %c0_i32 = arith.constant 0 : i32
    %c0_i32_0 = arith.constant 0 : i32
    return %arg0, %c0_i32 : i32, i32
  }
}

</mosaic_0001>

<bundles_post_ra>
// kernel: tpu_custom_call.1
= control target key start
LH: loop header
LB: loop body
LE: loop exit
PB: predicated region body
PF: predicated region fallthrough
CT: control target
= control target key end

     0   :  { %11 = vsyncpa [#allocation3], 0  ;;  %s1236_s0 = inlined_call_operand.vmem [shape: f32[32,32], index: 0, kind: input, shape index: {}]   ;;  %s1237_s1 = inlined_call_operand.vmem [shape: f32[128,32], index: 1, kind: input, shape index: {}]   ;;  %s1238_s2 = inlined_call_operand.vmem [shape: f32[1,128], index: 2, kind: input, shape index: {}]   ;;  %s1239_s3 = inlined_call_operand.hbm [shape: f32[32,128], index: 3, kind: output, shape index: {0}]   ;;  %s1240_s4 = inlined_call_operand.hbm [shape: f32[32,128], index: 4, kind: output, shape index: {1}]   ;;  %s1241_s5 = inlined_call_operand.hbm [shape: f32[32,128], index: 5, kind: output, shape index: {2}]  }
   0x1   :  { %13 = vsyncpa [#allocation3 + $0x1], 0 }
   0x2   :  { %14 = vsyncpa [#allocation5], 0 }
   0x3   :  { %16 = vsyncpa [#allocation5 + $0x1], 0  ;;  %s955_s18 = smov 0   ;;  %s957_s19 = smov 0  }
   0x4   :  { %s959_s20 = smov 0   ;;  %s961_s21 = smov 0  }
   0x5 LB: > { %s976_s22 = sadd.s32 4294967295, %s917_s21   ;;  %s1242_s23 = sadd.s32 4294967294, %s917_s21   ;;  %s917_s21 = sphi %s961_s21, %s1251_s21   ;;  %s913_s20 = sphi %s959_s20, %s1250_s20   ;;  %s909_s19 = sphi %s957_s19, %s1249_s19   ;;  %s905_s18 = sphi %s955_s18, %s1248_s18  }
   0x6   : > { %s980_s24 = sadd.s32 1, %s917_s21   ;;  %s97_s25 = sadd.s32 1, %s913_s20 }
   0x7   : > { %s94_s26 = ssub.s32 %s917_s21, %s980_s24  ;;  %p107_p0 = scmp.ne.s32.totalorder %s913_s20, %s909_s19 }
   0x8   : > { %p95_p1 = scmp.eq.s32.totalorder %s94_s26, 0  ;;  %p108_p2 = scmp.eq.s32.totalorder %s976_s22, 3 }
   0x9   : > { %p113_p3 = scmp.ne.s32.totalorder %s909_s19, %s905_s18  ;;  %p114_p4 = scmp.eq.s32.totalorder %s1242_s23, 3 }
   0xa   : > { %s993_s27 = scalar_select %p95_p1, %s913_s20, %s97_s25  }
   0xb   : > { %p995_p5 = por %p108_p2, %p107_p0  ;;  %p999_p6 = por %p114_p4, %p113_p3 }
   0xc   : > { %p623_p7 = scmp.ge.s32.totalorder %s917_s21, 1  ;;  %p197_p8 = scmp.lt.s32.totalorder %s917_s21, 5 }
   0xe   : > { %p198_p9 = pnand %p623_p7, %p197_p8 }
   0xf   : > { %v239_v0 = vld [vmem:[%s1237_s1] sm:$0xff] (!%p198_p9)  ;;  %v240_v1 = vld [vmem:[%s1237_s1 + $0x8] sm:$0xff] (!%p198_p9)  ;;  %vm262_vm0 = vcmask (!%p198_p9), 261120   ;;  %v919_v2 = vmov (!%p198_p9), 0.0|0.0   ;;  %vm920_vm2 = vmmov (!%p198_p9), 0   ;;  %v921_v5 = vmov (!%p198_p9), 0.0  }
  0x10   : > { %201 = sbr.rel (%p198_p9) target bundleno = 1506 (0x5e2), region = 32  ;;  %707 = vmatprep.subr.bf16.mxu0 (!%p198_p9), %v919_v2  ;;  %v708_v3 = vpack.c.bf16 (!%p198_p9), %v240_v1, %v239_v0  ;;  %vm1013_vm1 = vmpackc.low (!%p198_p9), %vm262_vm0, %vm262_vm0  ;;  %704 = vmatprep.mubr.msk.f32.mxu0 (!%p198_p9), %vm920_vm2, %v921_v5  ;;  %v241_v6 = vld [vmem:[%s1237_s1 + $0x10] sm:$0xff] (!%p198_p9)  ;;  %v242_v7 = vld [vmem:[%s1237_s1 + $0x18] sm:$0xff] (!%p198_p9)  ;;  %p234_p10 = scmp.lt.s32.totalorder (!%p198_p9), %s976_s22, 3  ;;  %v384_v28 = vlaneseq (!%p198_p9) }
  0x11   : > { %v712_v8 = vpack.c.bf16 (!%p198_p9), %v242_v7, %v241_v6  ;;  %v243_v9 = vld [vmem:[%s1237_s1 + $0x20] sm:$0xff] (!%p198_p9)  ;;  %v244_v10 = vld [vmem:[%s1237_s1 + $0x28] sm:$0xff] (!%p198_p9)  ;;  %v245_v12 = vld [vmem:[%s1237_s1 + $0x30] sm:$0xff] (!%p198_p9)  ;;  %s217_s12 = sand.u32 (!%p198_p9), 1, %s909_s19   ;;  %s455_s25 = sand.u32 (!%p198_p9), 1, %s976_s22  }
  0x12   : > { %710 = vmatpush3.bf16.xpose.msk.msra.mxu0 (!%p198_p9), %vm1013_vm1, %v708_v3  ;;  %v716_v11 = vpack.c.bf16 (!%p198_p9), %v244_v10, %v243_v9  ;;  %v246_v13 = vld [vmem:[%s1237_s1 + $0x38] sm:$0xff] (!%p198_p9)  ;;  %v247_v15 = vld [vmem:[%s1237_s1 + $0x40] sm:$0xff] (!%p198_p9)  ;;  %v248_v16 = vld [vmem:[%s1237_s1 + $0x48] sm:$0xff] (!%p198_p9)  ;;  %v1083_v29 = vand.u32 (!%p198_p9), 127, %v384_v28  ;;  %s1090_s15 = sshll.u32 (!%p198_p9), %s217_s12, 3  ;;  %s1117_s26 = sshll.u32 (!%p198_p9), %s976_s22, 7 }
  0x13   : > { %711 = vmatprep.subr.bf16.mxu0 (!%p198_p9), %v919_v2  ;;  %v720_v14 = vpack.c.bf16 (!%p198_p9), %v246_v13, %v245_v12  ;;  %v724_v17 = vpack.c.bf16 (!%p198_p9), %v248_v16, %v247_v15  ;;  %v249_v18 = vld [vmem:[%s1237_s1 + $0x50] sm:$0xff] (!%p198_p9)  ;;  %v250_v19 = vld [vmem:[%s1237_s1 + $0x58] sm:$0xff] (!%p198_p9)  ;;  %v251_v21 = vld [vmem:[%s1237_s1 + $0x60] sm:$0xff] (!%p198_p9)  ;;  %s219_s16 = scalar_lea.vmem (!%p198_p9), [#allocation2], %s1090_s15  ;;  %s226_s17 = scalar_lea.vmem (!%p198_p9), [#allocation4], %s1090_s15 }
  0x14   : > { %v728_v20 = vpack.c.bf16 (!%p198_p9), %v250_v19, %v249_v18  ;;  %v252_v22 = vld [vmem:[%s1237_s1 + $0x68] sm:$0xff] (!%p198_p9)  ;;  %v253_v24 = vld [vmem:[%s1237_s1 + $0x70] sm:$0xff] (!%p198_p9)  ;;  %v254_v25 = vld [vmem:[%s1237_s1 + $0x78] sm:$0xff] (!%p198_p9)  ;;  %vm386_vm3 = vcmp.lt.s32.totalorder (!%p198_p9), %v1083_v29, 8  ;;  %s1135_s13 = scalar_lea.sflag (!%p198_p9), [#allocation5], %s455_s25  ;;  %s922_s30 = smov (!%p198_p9), [#allocation4]  }
  0x15   : > { %v732_v23 = vpack.c.bf16 (!%p198_p9), %v252_v22, %v251_v21  ;;  %v736_v26 = vpack.c.bf16 (!%p198_p9), %v254_v25, %v253_v24  ;;  %v628_v30 = vld [vmem:[%s1238_s2] ss:$0 sm:$0xff] (!%p198_p9)  ;;  %s799_s6 = sshll.u32 (!%p198_p9), %s922_s30, 4  ;;  %s800_s6 = int_to_ptr.vmem [resolvable:$false] %s799_s6 }
  0x17   : > { %s235_s7 = scalar_select %p234_p10, %s976_s22, 3 }
  0x19   : > { %s627_s8 = sshll.u32 %s235_s7, 3  ;;  %s1123_s7 = scalar_lea.hbm %s1240_s4, %s1117_s26 }
  0x1a   : > { %714 = vmatpush3.bf16.xpose.msk.msra.mxu0 %vm1013_vm1, %v712_v8  ;;  %s237_s11 = scalar_lea.vmem %s1236_s0, %s627_s8  ;;  %s487_s8 = sshll.u32 %s226_s17, 4  ;;  %s1127_s8 = int_to_ptr.vmem [resolvable:$true] %s487_s8 }
  0x1b   : > { %715 = vmatprep.subr.bf16.mxu0 %v919_v2  ;;  %v238_v27 = vld [vmem:[%s237_s11] sm:$0xff]  ;;  %s1133_s11 = scalar_lea.hbm %s1239_s3, %s1117_s26  ;;  %s795_s14 = scalar_lea.vmem %s1127_s8, 128 }
  0x1c   : > { %p796_p11 = scmp.ne.s32.totalorder %s1127_s8, %s795_s14  ;;  %p802_p0 = scmp.lt.s32.totalorder %s1127_s8, %s800_s6 }
  0x1e   : > { %p797_p12 = pnand %p796_p11, %p995_p5 }
  0x20   : > { %p798_p13 = pneg %p797_p12 }
  0x22   : > { %718 = vmatpush3.bf16.xpose.msk.msra.mxu0 %vm1013_vm1, %v716_v11 }
  0x23   : > { %719 = vmatprep.subr.bf16.mxu0 %v919_v2 }
  0x2a   : > { %722 = vmatpush3.bf16.xpose.msk.msra.mxu0 %vm1013_vm1, %v720_v14 }
  0x2b   : > { %723 = vmatprep.subr.bf16.mxu0 %v919_v2 }
  0x32   : > { %726 = vmatpush3.bf16.xpose.msk.msra.mxu0 %vm1013_vm1, %v724_v17 }
  0x33   : > { %727 = vmatprep.subr.bf16.mxu0 %v919_v2 }
  0x3a   : > { %730 = vmatpush3.bf16.xpose.msk.msra.mxu0 %vm1013_vm1, %v728_v20 }
  0x3b   : > { %731 = vmatprep.subr.bf16.mxu0 %v919_v2 }
  0x42   : > { %734 = vmatpush3.bf16.xpose.msk.msra.mxu0 %vm1013_vm1, %v732_v23 }
  0x43   : > { %735 = vmatprep.subr.bf16.mxu0 %v919_v2 }
  0x4a   : > { %738 = vmatpush3.bf16.xpose.msk.msra.mxu0 %vm1013_vm1, %v736_v26 }
  0x51   : > { %705 = vmatmul.mubr.msk.f32.vlgmr.msra.gmra.mrb[0].mxu0 %vm262_vm0, %v238_v27 }
 0x124   : > { %v380_v31 = vpop.f32.mrb[0].mxu0 }
 0x125   : > { %v381_v32 = vadd.f32 %v628_v30, %v380_v31  ;;  %v706_v33 = vpop.f32.mrb[1].mxu0 }
 0x127   : > { %v387_v34 = vsel %vm386_vm3, %v381_v32, -1e+30 }
 0x128   : > { %389 = vmax.xlane.f32.xlu0 %v387_v34  ;;  %388 = vst [vmem:[%s219_s16] sm:$0xff] %v387_v34 }
 0x1b5   : > { %v390_v35 = vpop.xlane.xlu0 %389 }
 0x1b6   : > { %v391_v36 = vsub.f32 %v387_v34, %v390_v35 }
 0x1b8   : > { %v392_v37 = vmul.f32 1.442695, %v391_v36 }
 0x1ba   : > { %791 = vpow2.f32 %v392_v37 }
 0x1c4   : > { %v792_v38 = vpop.eup %791 }
 0x1c5   : > { %v394_v39 = vsel %vm386_vm3, %v792_v38, 0.0 }
 0x1c6   : > { %395 = vadd.xlane.f32.xlu0 %v394_v39 }
 0x253   : > { %v396_v40 = vpop.xlane.xlu0 %395 }
 0x254   : > { %793 = vrcp.f32 %v396_v40 }
 0x25e   : > { %v794_v41 = vpop.eup %793 }
 0x25f   : > { %v1096_v42 = vmul.f32 %v794_v41, %v394_v39 }
 0x261   : > { %400 = vmax.xlane.f32.xlu1 %v1096_v42  ;;  %399 = vst [vmem:[%s226_s17] sm:$0xff] %v1096_v42  ;;  %s801_s17 = scalar_lea.vmem %s800_s6, 256 }
 0x262   : > { %p803_p1 = scmp.lt.s32.totalorder %s801_s17, %s795_s14 }
 0x264   : > { %p804_p2 = por %p803_p1, %p802_p0 }
 0x266   : > { %p805_p3 = pnand %p804_p2, %p798_p13 }
 0x2ee   : > { %v401_v43 = vpop.xlane.xlu1 %400 }
 0x2ef   : > { %vm402_vm4 = vcmp.eq.f32.partialorder %v1096_v42, %v401_v43 }
 0x2f0   : > { %v403_v44 = vsel %vm402_vm4, %v1083_v29, 128 }
 0x2f1   : > { %v405_v45 = vshra.s32 %v403_v44, 16  ;;  %v404_v47 = vand.u32 65535, %v403_v44 }
 0x2f3   : > { %v407_v46 = vcvt.s32.f32 %v405_v45  ;;  %v406_v49 = vcvt.s32.f32 %v404_v47 }
 0x2f5   : > { %408 = vmin.xlane.f32.xlu1 %v407_v46 }
 0x382   : > { %v409_v48 = vpop.xlane.xlu1 %408 }
 0x383   : > { %vm410_vm5 = vcmp.eq.f32.partialorder %v407_v46, %v409_v48  ;;  %v415_v51 = vcvt.f32.s32 %v409_v48 }
 0x384   : > { %v411_v50 = vsel %vm410_vm5, %v406_v49, inf }
 0x385   : > { %412 = vmin.xlane.f32.xlu0 %v411_v50  ;;  %v416_v53 = vshll.u32 %v415_v51, 16 }
 0x412   : > { %v413_v52 = vpop.xlane.xlu0 %412 }
 0x413   : > { %v414_v54 = vcvt.f32.s32 %v413_v52 }
 0x415   : > { %v417_v55 = vadd.s32 %v416_v53, %v414_v54 }
 0x417   : > { %vm418_vm6 = vcmp.eq.s32.totalorder %v1083_v29, %v417_v55 }
 0x418   : > { %v1107_v56 = vsel %vm418_vm6, -inf, %v1096_v42 }
 0x419   : > { %420 = vmax.xlane.f32.xlu1 %v1107_v56 }
 0x4a6   : > { %v421_v57 = vpop.xlane.xlu1 %420 }
 0x4a7   : > { %vm422_vm7 = vcmp.eq.f32.partialorder %v1107_v56, %v421_v57 }
 0x4a8   : > { %v423_v58 = vsel %vm422_vm7, %v1083_v29, 128 }
 0x4a9   : > { %v425_v59 = vshra.s32 %v423_v58, 16  ;;  %v424_v61 = vand.u32 65535, %v423_v58 }
 0x4ab   : > { %v427_v60 = vcvt.s32.f32 %v425_v59  ;;  %v426_v63 = vcvt.s32.f32 %v424_v61 }
 0x4ad   : > { %428 = vmin.xlane.f32.xlu0 %v427_v60 }
 0x53a   : > { %v1112_v62 = vpop.xlane.xlu0 %428 }
 0x53b   : > { %vm430_vm8 = vcmp.eq.f32.partialorder %v427_v60, %v1112_v62 }
 0x53c   : > { %v431_v0 = vsel %vm430_vm8, %v426_v63, inf }
 0x53d   : > { %432 = vmin.xlane.f32.xlu1 %v431_v0 }
 0x53e   : > { %808 = shalt.err (!%p805_p3)
}
 0x53f   : > { %s809_s25 = scalar_lea.hbm %s1123_s7, 128  ;;  %s813_s30 = scalar_lea.hbm %s1240_s4, 512 }
 0x540   : > { %p810_p4 = scmp.ne.s32.totalorder %s1123_s7, %s809_s25  ;;  %p814_p9 = scmp.lt.u32.totalorder %s1123_s7, %s1240_s4 }
 0x541   : > { %p815_p10 = scmp.lt.u32.totalorder %s813_s30, %s809_s25  ;;  %p817_p12 = scmp.lt.u32.totalorder %s809_s25, %s1123_s7 }
 0x542   : > { %p811_p7 = pnand %p810_p4, %p995_p5 }
 0x543   : > { %p816_p11 = por %p815_p10, %p814_p9 }
 0x544   : > { %p812_p8 = pneg %p811_p7 }
 0x545   : > { %p818_p13 = por %p817_p12, %p816_p11 }
 0x547   : > { %p819_p0 = pnand %p818_p13, %p812_p8 }
 0x549   : > { %822 = shalt.err (!%p819_p0)
}
 0x54a   : > { %740 = dma.vmem_to_hbm [thread:$0]  (%p995_p5), %s1127_s8, 128, %s1123_s7, %s1135_s13  }
 0x54b   : > { %s474_s14 = sshll.u32 %s219_s16, 4  ;;  %s451_s23 = scalar_lea.sflag [#allocation3], %s217_s12  ;;  %s475_s14 = int_to_ptr.vmem [resolvable:$true] %s474_s14 }
 0x54c   : > { %s823_s17 = scalar_lea.vmem %s475_s14, 128  ;;  %s923_s25 = smov [#allocation2]  }
 0x54d   : > { %p824_p1 = scmp.ne.s32.totalorder %s475_s14, %s823_s17  ;;  %s827_s9 = sshll.u32 %s923_s25, 4  ;;  %s828_s9 = int_to_ptr.vmem [resolvable:$false] %s827_s9 }
 0x54e   : > { %s829_s10 = scalar_lea.vmem %s828_s9, 256  ;;  %p830_p4 = scmp.lt.s32.totalorder %s475_s14, %s828_s9 }
 0x54f   : > { %p825_p2 = pnand %p824_p1, %p995_p5  ;;  %p831_p7 = scmp.lt.s32.totalorder %s829_s10, %s823_s17 }
 0x551   : > { %p826_p3 = pneg %p825_p2  ;;  %p832_p8 = por %p831_p7, %p830_p4 }
 0x553   : > { %p833_p9 = pnand %p832_p8, %p826_p3 }
 0x555   : > { %836 = shalt.err (!%p833_p9)
}
 0x556   : > { %s837_s12 = scalar_lea.hbm %s1133_s11, 128  ;;  %s841_s8 = scalar_lea.hbm %s1239_s3, 512 }
 0x557   : > { %p838_p10 = scmp.ne.s32.totalorder %s1133_s11, %s837_s12  ;;  %p842_p13 = scmp.lt.u32.totalorder %s1133_s11, %s1239_s3 }
 0x558   : > { %p843_p0 = scmp.lt.u32.totalorder %s841_s8, %s837_s12  ;;  %p845_p2 = scmp.lt.u32.totalorder %s837_s12, %s1133_s11 }
 0x559   : > { %p839_p11 = pnand %p838_p10, %p995_p5 }
 0x55a   : > { %p844_p1 = por %p843_p0, %p842_p13 }
 0x55b   : > { %p840_p12 = pneg %p839_p11 }
 0x55c   : > { %p846_p3 = por %p845_p2, %p844_p1 }
 0x55e   : > { %p847_p4 = pnand %p846_p3, %p840_p12 }
 0x560   : > { %850 = shalt.err (!%p847_p4)
}
 0x561   : > { %739 = dma.vmem_to_hbm [thread:$0]  (%p995_p5), %s475_s14, 128, %s1133_s11, %s451_s23   ;;  %v435_v1 = vcvt.f32.s32 %v1112_v62  ;;  %v443_v2 = vshrl.u32 %v384_v28, 7 }
 0x562   : > { %s646_s17 = sshll.u32 %s976_s22, 3  ;;  %s233_s25 = scalar_lea.vmem [#allocation6], %s1090_s15 }
 0x563   : > { %v445_v3 = vstv %s646_s17  ;;  %v436_v5 = vshll.u32 %v435_v1, 16  ;;  %s500_s9 = sshll.u32 %s233_s25, 4  ;;  %s1191_s14 = scalar_lea.hbm %s1241_s5, %s1117_s26  ;;  %s1193_s9 = int_to_ptr.vmem [resolvable:$true] %s500_s9 }
 0x564   : > { %v446_v7 = vadd.s32 %v445_v3, %v443_v2  ;;  %s851_s15 = scalar_lea.vmem %s1193_s9, 128  ;;  %s924_s23 = smov [#allocation6]  }
 0x565   : > { %p852_p7 = scmp.ne.s32.totalorder %s1193_s9, %s851_s15  ;;  %s855_s10 = sshll.u32 %s924_s23, 4  ;;  %s856_s10 = int_to_ptr.vmem [resolvable:$false] %s855_s10 }
 0x566   : > { %vm447_vm10 = vcmp.lt.s32.totalorder %v446_v7, 20  ;;  %s857_s12 = scalar_lea.vmem %s856_s10, 256  ;;  %p858_p10 = scmp.lt.s32.totalorder %s1193_s9, %s856_s10 }
 0x567   : > { %p853_p8 = pnand %p852_p7, %p995_p5  ;;  %p859_p11 = scmp.lt.s32.totalorder %s857_s12, %s851_s15 }
 0x569   : > { %p854_p9 = pneg %p853_p8  ;;  %p860_p12 = por %p859_p11, %p858_p10 }
 0x56b   : > { %p861_p13 = pnand %p860_p12, %p854_p9 }
 0x5ca   : > { %v433_v4 = vpop.xlane.xlu1 %432 }
 0x5cb   : > { %v434_v6 = vcvt.f32.s32 %v433_v4 }
 0x5cd   : > { %v437_v8 = vadd.s32 %v436_v5, %v434_v6 }
 0x5cf   : > { %vm438_vm9 = vcmp.eq.s32.totalorder %v1083_v29, %v437_v8 }
 0x5d0   : > { %v439_v9 = vsel %vm438_vm9, -inf, %v1107_v56 }
 0x5d1   : > { %vm440_vm11 = vcmp.eq.f32.partialorder %v439_v9, -inf }
 0x5d2   : > { %v441_v10 = vsel %vm440_vm11, %v1096_v42, -inf }
 0x5d3   : > { %v448_v11 = vsel %vm447_vm10, %v441_v10, -inf }
 0x5d4   : > { %449 = vst [vmem:[%s233_s25] sm:$0xff] %v448_v11 }
 0x5d5   : > { %864 = shalt.err (!%p861_p13)
}
 0x5d6   : > { %s865_s26 = scalar_lea.hbm %s1191_s14, 128  ;;  %s869_s8 = scalar_lea.hbm %s1241_s5, 512 }
 0x5d7   : > { %p866_p0 = scmp.ne.s32.totalorder %s1191_s14, %s865_s26  ;;  %p870_p3 = scmp.lt.u32.totalorder %s1191_s14, %s1241_s5 }
 0x5d8   : > { %p871_p4 = scmp.lt.u32.totalorder %s869_s8, %s865_s26  ;;  %p873_p8 = scmp.lt.u32.totalorder %s865_s26, %s1191_s14 }
 0x5d9   : > { %p867_p1 = pnand %p866_p0, %p995_p5 }
 0x5da   : > { %p872_p7 = por %p871_p4, %p870_p3 }
 0x5db   : > { %p868_p2 = pneg %p867_p1 }
 0x5dc   : > { %p874_p9 = por %p873_p8, %p872_p7 }
 0x5de   : > { %p875_p10 = pnand %p874_p9, %p868_p2 }
 0x5e0   : > { %878 = shalt.err (!%p875_p10)
}
 0x5e1   : > { %741 = dma.vmem_to_hbm [thread:$0]  (%p995_p5), %s1193_s9, 128, %s1191_s14, %s1135_s13  }
 0x5e2 PF: > { %p755_p11 = scmp.ge.s32.totalorder %s917_s21, 2  ;;  %s512_s17 = sand.u32 1, %s905_s18  }
 0x5e3   : > { %s513_s25 = scalar_lea.sflag [#allocation3], %s512_s17 }
 0x5e4   : > { %p746_p12 = pnand %p755_p11, %p999_p6 }
 0x5e6   : > { %896 = dma.done.wait (!%p746_p12), %s513_s25, 128  }
 0x5e7   : > { %898 = vsyncadd (!%p746_p12), %s513_s25, 4294967168  ;;  %s1247_s22 = sadd.s32 4294967294, %s917_s21  }
 0x5e8   : > { %s521_s11 = sand.u32 1, %s1247_s22  }
 0x5e9   : > { %s522_s15 = scalar_lea.sflag [#allocation5], %s521_s11 }
 0x5ea   : > { %900 = dma.done.wait (!%p746_p12), %s522_s15, 256  }
 0x5eb   : > { %902 = vsyncadd (!%p746_p12), %s522_s15, 4294967040  ;;  %p19_p5 = scmp.ge.s32.totalorder %s980_s24, 6   ;;  %s1248_s18 = smov %s909_s19 }
 0x5ec   : > { %s1249_s19 = smov %s913_s20  ;;  %s1250_s20 = smov %s993_s27 }
 0x5ed   : > { %s1251_s21 = smov %s980_s24  ;;  %21 = sbr.rel (!%p19_p5) target bundleno = 5 (0x5), region = 99 }
 0x5f4   :  { %536 = vsyncpa [#allocation3], 1 }
 0x5f5   :  { %538 = vsyncpa [#allocation3 + $0x1], 1 }
 0x5f6   :  { %539 = vsyncpa [#allocation5], 1 }
 0x5f7   :  { %541 = vsyncpa [#allocation5 + $0x1], 1 }

// kernel: tpu_custom_call.1
= control target key start
LH: loop header
LB: loop body
LE: loop exit
PB: predicated region body
PF: predicated region fallthrough
CT: control target
= control target key end

     0   :  { %11 = vsyncpa [#allocation3], 0  ;;  %s1236_s0 = inlined_call_operand.vmem [shape: f32[32,32], index: 0, kind: input, shape index: {}]   ;;  %s1237_s1 = inlined_call_operand.vmem [shape: f32[128,32], index: 1, kind: input, shape index: {}]   ;;  %s1238_s2 = inlined_call_operand.vmem [shape: f32[1,128], index: 2, kind: input, shape index: {}]   ;;  %s1239_s3 = inlined_call_operand.hbm [shape: f32[32,128], index: 3, kind: output, shape index: {0}]   ;;  %s1240_s4 = inlined_call_operand.hbm [shape: f32[32,128], index: 4, kind: output, shape index: {1}]   ;;  %s1241_s5 = inlined_call_operand.hbm [shape: f32[32,128], index: 5, kind: output, shape index: {2}]  }
   0x1   :  { %13 = vsyncpa [#allocation3 + $0x1], 0 }
   0x2   :  { %14 = vsyncpa [#allocation5], 0 }
   0x3   :  { %16 = vsyncpa [#allocation5 + $0x1], 0  ;;  %s955_s18 = smov 0   ;;  %s957_s19 = smov 0  }
   0x4   :  { %s959_s20 = smov 0   ;;  %s961_s21 = smov 0  }
   0x5 LB: > { %s976_s22 = sadd.s32 4294967295, %s917_s21   ;;  %s1242_s23 = sadd.s32 4294967294, %s917_s21   ;;  %s917_s21 = sphi %s961_s21, %s1251_s21   ;;  %s913_s20 = sphi %s959_s20, %s1250_s20   ;;  %s909_s19 = sphi %s957_s19, %s1249_s19   ;;  %s905_s18 = sphi %s955_s18, %s1248_s18  }
   0x6   : > { %s980_s24 = sadd.s32 1, %s917_s21   ;;  %s97_s25 = sadd.s32 1, %s913_s20 }
   0x7   : > { %s94_s26 = ssub.s32 %s917_s21, %s980_s24  ;;  %p107_p0 = scmp.ne.s32.totalorder %s913_s20, %s909_s19 }
   0x8   : > { %p95_p1 = scmp.eq.s32.totalorder %s94_s26, 0  ;;  %p108_p2 = scmp.eq.s32.totalorder %s976_s22, 3 }
   0x9   : > { %p113_p3 = scmp.ne.s32.totalorder %s909_s19, %s905_s18  ;;  %p114_p4 = scmp.eq.s32.totalorder %s1242_s23, 3 }
   0xa   : > { %s993_s27 = scalar_select %p95_p1, %s913_s20, %s97_s25  }
   0xb   : > { %p995_p5 = por %p108_p2, %p107_p0  ;;  %p999_p6 = por %p114_p4, %p113_p3 }
   0xc   : > { %p623_p7 = scmp.ge.s32.totalorder %s917_s21, 1  ;;  %p197_p8 = scmp.lt.s32.totalorder %s917_s21, 5 }
   0xe   : > { %p198_p9 = pnand %p623_p7, %p197_p8 }
   0xf   : > { %v239_v0 = vld [vmem:[%s1237_s1] sm:$0xff] (!%p198_p9)  ;;  %v240_v1 = vld [vmem:[%s1237_s1 + $0x8] sm:$0xff] (!%p198_p9)  ;;  %vm262_vm0 = vcmask (!%p198_p9), 261120   ;;  %v919_v2 = vmov (!%p198_p9), 0.0|0.0   ;;  %vm920_vm2 = vmmov (!%p198_p9), 0   ;;  %v921_v5 = vmov (!%p198_p9), 0.0  }
  0x10   : > { %201 = sbr.rel (%p198_p9) target bundleno = 1506 (0x5e2), region = 32  ;;  %707 = vmatprep.subr.bf16.mxu0 (!%p198_p9), %v919_v2  ;;  %v708_v3 = vpack.c.bf16 (!%p198_p9), %v240_v1, %v239_v0  ;;  %vm1013_vm1 = vmpackc.low (!%p198_p9), %vm262_vm0, %vm262_vm0  ;;  %704 = vmatprep.mubr.msk.f32.mxu0 (!%p198_p9), %vm920_vm2, %v921_v5  ;;  %v241_v6 = vld [vmem:[%s1237_s1 + $0x10] sm:$0xff] (!%p198_p9)  ;;  %v242_v7 = vld [vmem:[%s1237_s1 + $0x18] sm:$0xff] (!%p198_p9)  ;;  %p234_p10 = scmp.lt.s32.totalorder (!%p198_p9), %s976_s22, 3  ;;  %v384_v28 = vlaneseq (!%p198_p9) }
  0x11   : > { %v712_v8 = vpack.c.bf16 (!%p198_p9), %v242_v7, %v241_v6  ;;  %v243_v9 = vld [vmem:[%s1237_s1 + $0x20] sm:$0xff] (!%p198_p9)  ;;  %v244_v10 = vld [vmem:[%s1237_s1 + $0x28] sm:$0xff] (!%p198_p9)  ;;  %v245_v12 = vld [vmem:[%s1237_s1 + $0x30] sm:$0xff] (!%p198_p9)  ;;  %s217_s12 = sand.u32 (!%p198_p9), 1, %s909_s19   ;;  %s455_s25 = sand.u32 (!%p198_p9), 1, %s976_s22  }
  0x12   : > { %710 = vmatpush3.bf16.xpose.msk.msra.mxu0 (!%p198_p9), %vm1013_vm1, %v708_v3  ;;  %v716_v11 = vpack.c.bf16 (!%p198_p9), %v244_v10, %v243_v9  ;;  %v246_v13 = vld [vmem:[%s1237_s1 + $0x38] sm:$0xff] (!%p198_p9)  ;;  %v247_v15 = vld [vmem:[%s1237_s1 + $0x40] sm:$0xff] (!%p198_p9)  ;;  %v248_v16 = vld [vmem:[%s1237_s1 + $0x48] sm:$0xff] (!%p198_p9)  ;;  %v1083_v29 = vand.u32 (!%p198_p9), 127, %v384_v28  ;;  %s1090_s15 = sshll.u32 (!%p198_p9), %s217_s12, 3  ;;  %s1117_s26 = sshll.u32 (!%p198_p9), %s976_s22, 7 }
  0x13   : > { %711 = vmatprep.subr.bf16.mxu0 (!%p198_p9), %v919_v2  ;;  %v720_v14 = vpack.c.bf16 (!%p198_p9), %v246_v13, %v245_v12  ;;  %v724_v17 = vpack.c.bf16 (!%p198_p9), %v248_v16, %v247_v15  ;;  %v249_v18 = vld [vmem:[%s1237_s1 + $0x50] sm:$0xff] (!%p198_p9)  ;;  %v250_v19 = vld [vmem:[%s1237_s1 + $0x58] sm:$0xff] (!%p198_p9)  ;;  %v251_v21 = vld [vmem:[%s1237_s1 + $0x60] sm:$0xff] (!%p198_p9)  ;;  %s219_s16 = scalar_lea.vmem (!%p198_p9), [#allocation2], %s1090_s15  ;;  %s226_s17 = scalar_lea.vmem (!%p198_p9), [#allocation4], %s1090_s15 }
  0x14   : > { %v728_v20 = vpack.c.bf16 (!%p198_p9), %v250_v19, %v249_v18  ;;  %v252_v22 = vld [vmem:[%s1237_s1 + $0x68] sm:$0xff] (!%p198_p9)  ;;  %v253_v24 = vld [vmem:[%s1237_s1 + $0x70] sm:$0xff] (!%p198_p9)  ;;  %v254_v25 = vld [vmem:[%s1237_s1 + $0x78] sm:$0xff] (!%p198_p9)  ;;  %vm386_vm3 = vcmp.lt.s32.totalorder (!%p198_p9), %v1083_v29, 8  ;;  %s1135_s13 = scalar_lea.sflag (!%p198_p9), [#allocation5], %s455_s25  ;;  %s922_s30 = smov (!%p198_p9), [#allocation4]  }
  0x15   : > { %v732_v23 = vpack.c.bf16 (!%p198_p9), %v252_v22, %v251_v21  ;;  %v736_v26 = vpack.c.bf16 (!%p198_p9), %v254_v25, %v253_v24  ;;  %v628_v30 = vld [vmem:[%s1238_s2] ss:$0 sm:$0xff] (!%p198_p9)  ;;  %s799_s6 = sshll.u32 (!%p198_p9), %s922_s30, 4  ;;  %s800_s6 = int_to_ptr.vmem [resolvable:$false] %s799_s6 }
  0x17   : > { %s235_s7 = scalar_select %p234_p10, %s976_s22, 3 }
  0x19   : > { %s627_s8 = sshll.u32 %s235_s7, 3  ;;  %s1123_s7 = scalar_lea.hbm %s1240_s4, %s1117_s26 }
  0x1a   : > { %714 = vmatpush3.bf16.xpose.msk.msra.mxu0 %vm1013_vm1, %v712_v8  ;;  %s237_s11 = scalar_lea.vmem %s1236_s0, %s627_s8  ;;  %s487_s8 = sshll.u32 %s226_s17, 4  ;;  %s1127_s8 = int_to_ptr.vmem [resolvable:$true] %s487_s8 }
  0x1b   : > { %715 = vmatprep.subr.bf16.mxu0 %v919_v2  ;;  %v238_v27 = vld [vmem:[%s237_s11] sm:$0xff]  ;;  %s1133_s11 = scalar_lea.hbm %s1239_s3, %s1117_s26  ;;  %s795_s14 = scalar_lea.vmem %s1127_s8, 128 }
  0x1c   : > { %p796_p11 = scmp.ne.s32.totalorder %s1127_s8, %s795_s14  ;;  %p802_p0 = scmp.lt.s32.totalorder %s1127_s8, %s800_s6 }
  0x1e   : > { %p797_p12 = pnand %p796_p11, %p995_p5 }
  0x20   : > { %p798_p13 = pneg %p797_p12 }
  0x22   : > { %718 = vmatpush3.bf16.xpose.msk.msra.mxu0 %vm1013_vm1, %v716_v11 }
  0x23   : > { %719 = vmatprep.subr.bf16.mxu0 %v919_v2 }
  0x2a   : > { %722 = vmatpush3.bf16.xpose.msk.msra.mxu0 %vm1013_vm1, %v720_v14 }
  0x2b   : > { %723 = vmatprep.subr.bf16.mxu0 %v919_v2 }
  0x32   : > { %726 = vmatpush3.bf16.xpose.msk.msra.mxu0 %vm1013_vm1, %v724_v17 }
  0x33   : > { %727 = vmatprep.subr.bf16.mxu0 %v919_v2 }
  0x3a   : > { %730 = vmatpush3.bf16.xpose.msk.msra.mxu0 %vm1013_vm1, %v728_v20 }
  0x3b   : > { %731 = vmatprep.subr.bf16.mxu0 %v919_v2 }
  0x42   : > { %734 = vmatpush3.bf16.xpose.msk.msra.mxu0 %vm1013_vm1, %v732_v23 }
  0x43   : > { %735 = vmatprep.subr.bf16.mxu0 %v919_v2 }
  0x4a   : > { %738 = vmatpush3.bf16.xpose.msk.msra.mxu0 %vm1013_vm1, %v736_v26 }
  0x51   : > { %705 = vmatmul.mubr.msk.f32.vlgmr.msra.gmra.mrb[0].mxu0 %vm262_vm0, %v238_v27 }
 0x124   : > { %v380_v31 = vpop.f32.mrb[0].mxu0 }
 0x125   : > { %v381_v32 = vadd.f32 %v628_v30, %v380_v31  ;;  %v706_v33 = vpop.f32.mrb[1].mxu0 }
 0x127   : > { %v387_v34 = vsel %vm386_vm3, %v381_v32, -1e+30 }
 0x128   : > { %389 = vmax.xlane.f32.xlu0 %v387_v34  ;;  %388 = vst [vmem:[%s219_s16] sm:$0xff] %v387_v34 }
 0x1b5   : > { %v390_v35 = vpop.xlane.xlu0 %389 }
 0x1b6   : > { %v391_v36 = vsub.f32 %v387_v34, %v390_v35 }
 0x1b8   : > { %v392_v37 = vmul.f32 1.442695, %v391_v36 }
 0x1ba   : > { %791 = vpow2.f32 %v392_v37 }
 0x1c4   : > { %v792_v38 = vpop.eup %791 }
 0x1c5   : > { %v394_v39 = vsel %vm386_vm3, %v792_v38, 0.0 }
 0x1c6   : > { %395 = vadd.xlane.f32.xlu0 %v394_v39 }
 0x253   : > { %v396_v40 = vpop.xlane.xlu0 %395 }
 0x254   : > { %793 = vrcp.f32 %v396_v40 }
 0x25e   : > { %v794_v41 = vpop.eup %793 }
 0x25f   : > { %v1096_v42 = vmul.f32 %v794_v41, %v394_v39 }
 0x261   : > { %400 = vmax.xlane.f32.xlu1 %v1096_v42  ;;  %399 = vst [vmem:[%s226_s17] sm:$0xff] %v1096_v42  ;;  %s801_s17 = scalar_lea.vmem %s800_s6, 256 }
 0x262   : > { %p803_p1 = scmp.lt.s32.totalorder %s801_s17, %s795_s14 }
 0x264   : > { %p804_p2 = por %p803_p1, %p802_p0 }
 0x266   : > { %p805_p3 = pnand %p804_p2, %p798_p13 }
 0x2ee   : > { %v401_v43 = vpop.xlane.xlu1 %400 }
 0x2ef   : > { %vm402_vm4 = vcmp.eq.f32.partialorder %v1096_v42, %v401_v43 }
 0x2f0   : > { %v403_v44 = vsel %vm402_vm4, %v1083_v29, 128 }
 0x2f1   : > { %v405_v45 = vshra.s32 %v403_v44, 16  ;;  %v404_v47 = vand.u32 65535, %v403_v44 }
 0x2f3   : > { %v407_v46 = vcvt.s32.f32 %v405_v45  ;;  %v406_v49 = vcvt.s32.f32 %v404_v47 }
 0x2f5   : > { %408 = vmin.xlane.f32.xlu1 %v407_v46 }
 0x382   : > { %v409_v48 = vpop.xlane.xlu1 %408 }
 0x383   : > { %vm410_vm5 = vcmp.eq.f32.partialorder %v407_v46, %v409_v48  ;;  %v415_v51 = vcvt.f32.s32 %v409_v48 }
 0x384   : > { %v411_v50 = vsel %vm410_vm5, %v406_v49, inf }
 0x385   : > { %412 = vmin.xlane.f32.xlu0 %v411_v50  ;;  %v416_v53 = vshll.u32 %v415_v51, 16 }
 0x412   : > { %v413_v52 = vpop.xlane.xlu0 %412 }
 0x413   : > { %v414_v54 = vcvt.f32.s32 %v413_v52 }
 0x415   : > { %v417_v55 = vadd.s32 %v416_v53, %v414_v54 }
 0x417   : > { %vm418_vm6 = vcmp.eq.s32.totalorder %v1083_v29, %v417_v55 }
 0x418   : > { %v1107_v56 = vsel %vm418_vm6, -inf, %v1096_v42 }
 0x419   : > { %420 = vmax.xlane.f32.xlu1 %v1107_v56 }
 0x4a6   : > { %v421_v57 = vpop.xlane.xlu1 %420 }
 0x4a7   : > { %vm422_vm7 = vcmp.eq.f32.partialorder %v1107_v56, %v421_v57 }
 0x4a8   : > { %v423_v58 = vsel %vm422_vm7, %v1083_v29, 128 }
 0x4a9   : > { %v425_v59 = vshra.s32 %v423_v58, 16  ;;  %v424_v61 = vand.u32 65535, %v423_v58 }
 0x4ab   : > { %v427_v60 = vcvt.s32.f32 %v425_v59  ;;  %v426_v63 = vcvt.s32.f32 %v424_v61 }
 0x4ad   : > { %428 = vmin.xlane.f32.xlu0 %v427_v60 }
 0x53a   : > { %v1112_v62 = vpop.xlane.xlu0 %428 }
 0x53b   : > { %vm430_vm8 = vcmp.eq.f32.partialorder %v427_v60, %v1112_v62 }
 0x53c   : > { %v431_v0 = vsel %vm430_vm8, %v426_v63, inf }
 0x53d   : > { %432 = vmin.xlane.f32.xlu1 %v431_v0 }
 0x53e   : > { %808 = shalt.err (!%p805_p3)
}
 0x53f   : > { %s809_s25 = scalar_lea.hbm %s1123_s7, 128  ;;  %s813_s30 = scalar_lea.hbm %s1240_s4, 512 }
 0x540   : > { %p810_p4 = scmp.ne.s32.totalorder %s1123_s7, %s809_s25  ;;  %p814_p9 = scmp.lt.u32.totalorder %s1123_s7, %s1240_s4 }
 0x541   : > { %p815_p10 = scmp.lt.u32.totalorder %s813_s30, %s809_s25  ;;  %p817_p12 = scmp.lt.u32.totalorder %s809_s25, %s1123_s7 }
 0x542   : > { %p811_p7 = pnand %p810_p4, %p995_p5 }
 0x543   : > { %p816_p11 = por %p815_p10, %p814_p9 }
 0x544   : > { %p812_p8 = pneg %p811_p7 }
 0x545   : > { %p818_p13 = por %p817_p12, %p816_p11 }
 0x547   : > { %p819_p0 = pnand %p818_p13, %p812_p8 }
 0x549   : > { %822 = shalt.err (!%p819_p0)
}
 0x54a   : > { %740 = dma.vmem_to_hbm [thread:$0]  (%p995_p5), %s1127_s8, 128, %s1123_s7, %s1135_s13  }
 0x54b   : > { %s474_s14 = sshll.u32 %s219_s16, 4  ;;  %s451_s23 = scalar_lea.sflag [#allocation3], %s217_s12  ;;  %s475_s14 = int_to_ptr.vmem [resolvable:$true] %s474_s14 }
 0x54c   : > { %s823_s17 = scalar_lea.vmem %s475_s14, 128  ;;  %s923_s25 = smov [#allocation2]  }
 0x54d   : > { %p824_p1 = scmp.ne.s32.totalorder %s475_s14, %s823_s17  ;;  %s827_s9 = sshll.u32 %s923_s25, 4  ;;  %s828_s9 = int_to_ptr.vmem [resolvable:$false] %s827_s9 }
 0x54e   : > { %s829_s10 = scalar_lea.vmem %s828_s9, 256  ;;  %p830_p4 = scmp.lt.s32.totalorder %s475_s14, %s828_s9 }
 0x54f   : > { %p825_p2 = pnand %p824_p1, %p995_p5  ;;  %p831_p7 = scmp.lt.s32.totalorder %s829_s10, %s823_s17 }
 0x551   : > { %p826_p3 = pneg %p825_p2  ;;  %p832_p8 = por %p831_p7, %p830_p4 }
 0x553   : > { %p833_p9 = pnand %p832_p8, %p826_p3 }
 0x555   : > { %836 = shalt.err (!%p833_p9)
}
 0x556   : > { %s837_s12 = scalar_lea.hbm %s1133_s11, 128  ;;  %s841_s8 = scalar_lea.hbm %s1239_s3, 512 }
 0x557   : > { %p838_p10 = scmp.ne.s32.totalorder %s1133_s11, %s837_s12  ;;  %p842_p13 = scmp.lt.u32.totalorder %s1133_s11, %s1239_s3 }
 0x558   : > { %p843_p0 = scmp.lt.u32.totalorder %s841_s8, %s837_s12  ;;  %p845_p2 = scmp.lt.u32.totalorder %s837_s12, %s1133_s11 }
 0x559   : > { %p839_p11 = pnand %p838_p10, %p995_p5 }
 0x55a   : > { %p844_p1 = por %p843_p0, %p842_p13 }
 0x55b   : > { %p840_p12 = pneg %p839_p11 }
 0x55c   : > { %p846_p3 = por %p845_p2, %p844_p1 }
 0x55e   : > { %p847_p4 = pnand %p846_p3, %p840_p12 }
 0x560   : > { %850 = shalt.err (!%p847_p4)
}
 0x561   : > { %739 = dma.vmem_to_hbm [thread:$0]  (%p995_p5), %s475_s14, 128, %s1133_s11, %s451_s23   ;;  %v435_v1 = vcvt.f32.s32 %v1112_v62  ;;  %v443_v2 = vshrl.u32 %v384_v28, 7 }
 0x562   : > { %s646_s17 = sshll.u32 %s976_s22, 3  ;;  %s233_s25 = scalar_lea.vmem [#allocation6], %s1090_s15 }
 0x563   : > { %v445_v3 = vstv %s646_s17  ;;  %v436_v5 = vshll.u32 %v435_v1, 16  ;;  %s500_s9 = sshll.u32 %s233_s25, 4  ;;  %s1191_s14 = scalar_lea.hbm %s1241_s5, %s1117_s26  ;;  %s1193_s9 = int_to_ptr.vmem [resolvable:$true] %s500_s9 }
 0x564   : > { %v446_v7 = vadd.s32 %v445_v3, %v443_v2  ;;  %s851_s15 = scalar_lea.vmem %s1193_s9, 128  ;;  %s924_s23 = smov [#allocation6]  }
 0x565   : > { %p852_p7 = scmp.ne.s32.totalorder %s1193_s9, %s851_s15  ;;  %s855_s10 = sshll.u32 %s924_s23, 4  ;;  %s856_s10 = int_to_ptr.vmem [resolvable:$false] %s855_s10 }
 0x566   : > { %vm447_vm10 = vcmp.lt.s32.totalorder %v446_v7, 20  ;;  %s857_s12 = scalar_lea.vmem %s856_s10, 256  ;;  %p858_p10 = scmp.lt.s32.totalorder %s1193_s9, %s856_s10 }
 0x567   : > { %p853_p8 = pnand %p852_p7, %p995_p5  ;;  %p859_p11 = scmp.lt.s32.totalorder %s857_s12, %s851_s15 }
 0x569   : > { %p854_p9 = pneg %p853_p8  ;;  %p860_p12 = por %p859_p11, %p858_p10 }
 0x56b   : > { %p861_p13 = pnand %p860_p12, %p854_p9 }
 0x5ca   : > { %v433_v4 = vpop.xlane.xlu1 %432 }
 0x5cb   : > { %v434_v6 = vcvt.f32.s32 %v433_v4 }
 0x5cd   : > { %v437_v8 = vadd.s32 %v436_v5, %v434_v6 }
 0x5cf   : > { %vm438_vm9 = vcmp.eq.s32.totalorder %v1083_v29, %v437_v8 }
 0x5d0   : > { %v439_v9 = vsel %vm438_vm9, -inf, %v1107_v56 }
 0x5d1   : > { %vm440_vm11 = vcmp.eq.f32.partialorder %v439_v9, -inf }
 0x5d2   : > { %v441_v10 = vsel %vm440_vm11, %v1096_v42, -inf }
 0x5d3   : > { %v448_v11 = vsel %vm447_vm10, %v441_v10, -inf }
 0x5d4   : > { %449 = vst [vmem:[%s233_s25] sm:$0xff] %v448_v11 }
 0x5d5   : > { %864 = shalt.err (!%p861_p13)
}
 0x5d6   : > { %s865_s26 = scalar_lea.hbm %s1191_s14, 128  ;;  %s869_s8 = scalar_lea.hbm %s1241_s5, 512 }
 0x5d7   : > { %p866_p0 = scmp.ne.s32.totalorder %s1191_s14, %s865_s26  ;;  %p870_p3 = scmp.lt.u32.totalorder %s1191_s14, %s1241_s5 }
 0x5d8   : > { %p871_p4 = scmp.lt.u32.totalorder %s869_s8, %s865_s26  ;;  %p873_p8 = scmp.lt.u32.totalorder %s865_s26, %s1191_s14 }
 0x5d9   : > { %p867_p1 = pnand %p866_p0, %p995_p5 }
 0x5da   : > { %p872_p7 = por %p871_p4, %p870_p3 }
 0x5db   : > { %p868_p2 = pneg %p867_p1 }
 0x5dc   : > { %p874_p9 = por %p873_p8, %p872_p7 }
 0x5de   : > { %p875_p10 = pnand %p874_p9, %p868_p2 }
 0x5e0   : > { %878 = shalt.err (!%p875_p10)
}
 0x5e1   : > { %741 = dma.vmem_to_hbm [thread:$0]  (%p995_p5), %s1193_s9, 128, %s1191_s14, %s1135_s13  }
 0x5e2 PF: > { %p755_p11 = scmp.ge.s32.totalorder %s917_s21, 2  ;;  %s512_s17 = sand.u32 1, %s905_s18  }
 0x5e3   : > { %s513_s25 = scalar_lea.sflag [#allocation3], %s512_s17 }
 0x5e4   : > { %p746_p12 = pnand %p755_p11, %p999_p6 }
 0x5e6   : > { %896 = dma.done.wait (!%p746_p12), %s513_s25, 128  }
 0x5e7   : > { %898 = vsyncadd (!%p746_p12), %s513_s25, 4294967168  ;;  %s1247_s22 = sadd.s32 4294967294, %s917_s21  }
 0x5e8   : > { %s521_s11 = sand.u32 1, %s1247_s22  }
 0x5e9   : > { %s522_s15 = scalar_lea.sflag [#allocation5], %s521_s11 }
 0x5ea   : > { %900 = dma.done.wait (!%p746_p12), %s522_s15, 256  }
 0x5eb   : > { %902 = vsyncadd (!%p746_p12), %s522_s15, 4294967040  ;;  %p19_p5 = scmp.ge.s32.totalorder %s980_s24, 6   ;;  %s1248_s18 = smov %s909_s19 }
 0x5ec   : > { %s1249_s19 = smov %s913_s20  ;;  %s1250_s20 = smov %s993_s27 }
 0x5ed   : > { %s1251_s21 = smov %s980_s24  ;;  %21 = sbr.rel (!%p19_p5) target bundleno = 5 (0x5), region = 99 }
 0x5f4   :  { %536 = vsyncpa [#allocation3], 1 }
 0x5f5   :  { %538 = vsyncpa [#allocation3 + $0x1], 1 }
 0x5f6   :  { %539 = vsyncpa [#allocation5], 1 }
 0x5f7   :  { %541 = vsyncpa [#allocation5 + $0x1], 1 }

</bundles_post_ra>
